<compile_context>
chip_gen: v7x
topology: tpu7x:2x2x1
jax: 0.10.0
libtpu: 0.0.40
codegen_flags: <defaults>
</compile_context>

<pallas_src>
import math
from typing import NamedTuple, Optional

import jax
import jax.numpy as jnp
from jax.experimental import pallas as pl
from jax.experimental.pallas import tpu as pltpu

_GELU_C = math.sqrt(2.0 / math.pi)


def _round_up(a: int, b: int) -> int:
    return ((a + b - 1) // b) * b


def _new_gelu_f32(h):
    # Exact tanh-approx GELU from the reference module, in f32.
    return 0.5 * h * (1.0 + jnp.tanh(_GELU_C * (h + 0.044715 * (h * h * h))))


# ----------------------------- kernels --------------------------------------

def _mlp_kernel_multi_k(x_ref, wfc_ref, bfc_ref, wproj_ref, bproj_ref, o_ref,
                        acc_ref):
    # x_ref:     (tm, n_pad)   compute dtype
    # wfc_ref:   (n_pad, th)   compute dtype
    # bfc_ref:   (1, th)       f32
    # wproj_ref: (th, n_pad)   compute dtype
    # bproj_ref: (1, n_pad)    f32
    # o_ref:     (tm, n_pad)   output dtype
    # acc_ref:   (tm, n_pad)   f32 scratch accumulator
    k = pl.program_id(1)

    @pl.when(k == 0)
    def _():
        acc_ref[...] = jnp.zeros_like(acc_ref)

    h = jnp.dot(x_ref[...], wfc_ref[...], preferred_element_type=jnp.float32)
    h = _new_gelu_f32(h + bfc_ref[...])
    acc_ref[...] += jnp.dot(h.astype(wproj_ref.dtype), wproj_ref[...],
                            preferred_element_type=jnp.float32)

    @pl.when(k == pl.num_programs(1) - 1)
    def _():
        # dropout (eval / p=0.0) -> identity
        o_ref[...] = (acc_ref[...] + bproj_ref[...]).astype(o_ref.dtype)


def _mlp_kernel_single_k(x_ref, wfc_ref, bfc_ref, wproj_ref, bproj_ref, o_ref):
    # Specialized path: whole hidden dim in one slab -> no accumulator scratch,
    # no pl.when branches, direct store.
    h = jnp.dot(x_ref[...], wfc_ref[...], preferred_element_type=jnp.float32)
    h = _new_gelu_f32(h + bfc_ref[...])
    out = jnp.dot(h.astype(wproj_ref.dtype), wproj_ref[...],
                  preferred_element_type=jnp.float32)
    # dropout (eval / p=0.0) -> identity
    o_ref[...] = (out + bproj_ref[...]).astype(o_ref.dtype)


# ----------------------- hardware / tiling heuristics -----------------------

def _vmem_capacity_bytes() -> int:
    try:
        return int(pltpu.get_tpu_info().vmem_capacity_bytes)
    except Exception:
        return 128 * 1024 * 1024  # conservative default (v5e/v6e size)


def _vmem_limit_bytes(vmem_cap: int) -> int:
    # Leave headroom for compiler internal scratch / semaphores:
    # ~108 MiB on 128 MiB chips, ~54 MiB on v7x's 64 MiB.
    return min(int(vmem_cap * 0.85), vmem_cap - 8 * 1024 * 1024)


def _default_th(hidden: int, n_embd: int, vmem_cap: int) -> int:
    n_pad = _round_up(n_embd, 128)
    if vmem_cap >= 96 * 1024 * 1024:        # v5e / v6e (128 MiB VMEM)
        th = 1024
    else:                                    # v7x (64 MiB VMEM)
        th = 512 if n_pad < 8192 else 256
    return max(128, min(th, _round_up(hidden, 128)))


def _choose_tm(M: int, tm_max: int) -> int:
    if M < 256:
        # Single small row tile; multiple of 16 for bf16 sublane packing.
        return max(8, _round_up(M, 16))
    # Keep at least 2 row tiles so both v7x TensorCores get "parallel" work.
    tm_cap = max(128, min(tm_max, _round_up((M + 1) // 2, 128)))
    candidates = range(128, tm_cap + 1, 128)
    # Minimize total padded rows processed; prefer the largest tile on ties.
    return min(candidates, key=lambda c: (_round_up(M, c), -c))


def _vmem_estimate(tm, th, n_pad, cbytes, obytes, multi_k) -> int:
    est = 2 * tm * n_pad * cbytes          # x tile, double-buffered
    est += 2 * n_pad * th * cbytes         # W_fc slab
    est += 2 * th * n_pad * cbytes         # W_proj slab
    est += 2 * (th + n_pad) * 4            # biases (f32)
    est += 2 * tm * n_pad * obytes         # output tile
    if multi_k:
        est += tm * n_pad * 4              # f32 accumulator scratch
    return est


# --------------------------- host-side wrappers ------------------------------

class MLPParams(NamedTuple):
    wfc_t: jax.Array    # (n_pad, h_pad)  compute dtype
    bfc: jax.Array      # (1, h_pad)      f32
    wproj_t: jax.Array  # (h_pad, n_pad)  compute dtype
    bproj: jax.Array    # (1, n_pad)      f32
    n_embd: int
    hidden: int
    th: int


def prepare_mlp_weights(w_fc, b_fc, w_proj, b_proj, *,
                        compute_dtype=jnp.bfloat16,
                        th: Optional[int] = None) -> MLPParams:
    """One-time weight prep: transpose, pad to lane-dense sizes, cast.

    Hoisted out of the per-call path -- keep the returned MLPParams as the
    stored parameters so repeated inference calls never re-pad / re-cast the
    weight bytes. w_fc: (4n, n) torch layout, w_proj: (n, 4n).
    """
    hidden, n_embd = w_fc.shape
    if th is None:
        th = _default_th(hidden, n_embd, _vmem_capacity_bytes())
    assert th % 128 == 0, "th must be a multiple of 128 (MXU/lane alignment)"
    th = min(th, _round_up(hidden, 128))

    n_pad = _round_up(n_embd, 128)
    h_pad = _round_up(hidden, th)

    wfc_t = jnp.pad(w_fc.T, ((0, n_pad - n_embd), (0, h_pad - hidden)))
    wfc_t = wfc_t.astype(compute_dtype)
    wproj_t = jnp.pad(w_proj.T, ((0, h_pad - hidden), (0, n_pad - n_embd)))
    wproj_t = wproj_t.astype(compute_dtype)
    bfc = jnp.pad(b_fc, (0, h_pad - hidden)).reshape(1, h_pad).astype(jnp.float32)
    bproj = jnp.pad(b_proj, (0, n_pad - n_embd)).reshape(1, n_pad).astype(jnp.float32)
    return MLPParams(wfc_t, bfc, wproj_t, bproj, n_embd, hidden, th)


def mlp_pallas(x, params: MLPParams, *, tm: Optional[int] = None):
    """Fused MLP forward. x: (B, T, n_embd) -> (B, T, n_embd)."""
    B, T, n_embd = x.shape
    assert n_embd == params.n_embd

    n_pad, h_pad = params.wfc_t.shape
    th = params.th
    k_tiles = h_pad // th
    multi_k = k_tiles > 1

    compute_dtype = params.wfc_t.dtype
    cbytes = jnp.dtype(compute_dtype).itemsize
    obytes = jnp.dtype(x.dtype).itemsize

    vmem_cap = _vmem_capacity_bytes()
    vmem_limit = _vmem_limit_bytes(vmem_cap)
    tm_max = 1024 if vmem_cap >= 96 * 1024 * 1024 else 512

    M = B * T
    if tm is None:
        tm = _choose_tm(M, tm_max)
        budget = int(vmem_limit * 0.9)
        while tm > 128 and _vmem_estimate(tm, th, n_pad, cbytes, obytes,
                                          multi_k) > budget:
            tm -= 128
    m_pad = _round_up(M, tm)

    x2 = x.reshape(M, n_embd)
    x2 = jnp.pad(x2, ((0, m_pad - M), (0, n_pad - n_embd))).astype(compute_dtype)

    cost = pl.CostEstimate(
        flops=4 * M * params.n_embd * params.hidden,
        transcendentals=M * params.hidden,
        bytes_accessed=(params.wfc_t.size + params.wproj_t.size) * cbytes
        + 2 * M * params.n_embd * obytes,
    )

    if multi_k:
        out2 = pl.pallas_call(
            _mlp_kernel_multi_k,
            out_shape=jax.ShapeDtypeStruct((m_pad, n_pad), x.dtype),
            grid_spec=pltpu.PrefetchScalarGridSpec(
                num_scalar_prefetch=0,
                grid=(m_pad // tm, k_tiles),
                in_specs=[
                    pl.BlockSpec((tm, n_pad), lambda i, k: (i, 0)),   # x rows
                    pl.BlockSpec((n_pad, th), lambda i, k: (0, k)),   # W_fc slab
                    pl.BlockSpec((1, th), lambda i, k: (0, k)),       # b_fc slab
                    pl.BlockSpec((th, n_pad), lambda i, k: (k, 0)),   # W_proj slab
                    pl.BlockSpec((1, n_pad), lambda i, k: (0, 0)),    # b_proj
                ],
                out_specs=pl.BlockSpec((tm, n_pad), lambda i, k: (i, 0)),
                scratch_shapes=[pltpu.VMEM((tm, n_pad), jnp.float32)],
            ),
            compiler_params=pltpu.CompilerParams(
                dimension_semantics=("parallel", "arbitrary"),
                vmem_limit_bytes=vmem_limit,
            ),
            cost_estimate=cost,
        )(x2, params.wfc_t, params.bfc, params.wproj_t, params.bproj)
    else:
        out2 = pl.pallas_call(
            _mlp_kernel_single_k,
            out_shape=jax.ShapeDtypeStruct((m_pad, n_pad), x.dtype),
            grid_spec=pltpu.PrefetchScalarGridSpec(
                num_scalar_prefetch=0,
                grid=(m_pad // tm,),
                in_specs=[
                    pl.BlockSpec((tm, n_pad), lambda i: (i, 0)),      # x rows
                    pl.BlockSpec((n_pad, h_pad), lambda i: (0, 0)),   # W_fc
                    pl.BlockSpec((1, h_pad), lambda i: (0, 0)),       # b_fc
                    pl.BlockSpec((h_pad, n_pad), lambda i: (0, 0)),   # W_proj
                    pl.BlockSpec((1, n_pad), lambda i: (0, 0)),       # b_proj
                ],
                out_specs=pl.BlockSpec((tm, n_pad), lambda i: (i, 0)),
            ),
            compiler_params=pltpu.CompilerParams(
                dimension_semantics=("parallel",),
                vmem_limit_bytes=vmem_limit,
            ),
            cost_estimate=cost,
        )(x2, params.wfc_t, params.bfc, params.wproj_t, params.bproj)

    return out2[:M, :n_embd].reshape(B, T, n_embd)


def mlp_forward(x, w_fc, b_fc, w_proj, b_proj, *,
                compute_dtype=jnp.bfloat16, tm=None, th=None):
    """Convenience one-shot wrapper (prep + call)."""
    params = prepare_mlp_weights(w_fc, b_fc, w_proj, b_proj,
                                 compute_dtype=compute_dtype, th=th)
    return mlp_pallas(x, params, tm=tm)


# ------------------------------ reference -----------------------------------

def _reference(x, w_fc, b_fc, w_proj, b_proj):
    h = jnp.einsum("btc,hc->bth", x, w_fc) + b_fc
    h = _new_gelu_f32(h)
    return jnp.einsum("bth,ch->btc", h, w_proj) + b_proj


def _rand_linear(key, out_f, in_f):
    kw, kb = jax.random.split(key)
    bound = 1.0 / math.sqrt(in_f)
    w = jax.random.uniform(kw, (out_f, in_f), jnp.float32, -bound, bound)
    b = jax.random.uniform(kb, (out_f,), jnp.float32, -bound, bound)
    return w, b


if __name__ == "__main__":
    key = jax.random.PRNGKey(0)

    # --- Config 1: n_embd=32, hidden=128 (single-k specialized path) --------
    B, T, n_embd = 2, 8, 32
    hidden = 4 * n_embd
    k0, k1, k2 = jax.random.split(key, 3)
    x = jax.random.normal(k0, (B, T, n_embd), dtype=jnp.float32)
    w_fc, b_fc = _rand_linear(k1, hidden, n_embd)
    w_proj, b_proj = _rand_linear(k2, n_embd, hidden)
    ref = _reference(x, w_fc, b_fc, w_proj, b_proj)

    # f32 compute path (tight tolerance); weight prep hoisted, reused below.
    params_f32 = prepare_mlp_weights(w_fc, b_fc, w_proj, b_proj,
                                     compute_dtype=jnp.float32)
    out_f32 = jax.block_until_ready(mlp_pallas(x, params_f32))
    assert out_f32.shape == (B, T, n_embd)
    assert jnp.allclose(out_f32, ref, atol=1e-4, rtol=1e-4), "f32 path mismatch"

    # Default bf16 compute path (f32 accumulation); looser tolerance.
    params_bf16 = prepare_mlp_weights(w_fc, b_fc, w_proj, b_proj,
                                      compute_dtype=jnp.bfloat16)
    out_bf16 = jax.block_until_ready(mlp_pallas(x, params_bf16))
    assert out_bf16.shape == (B, T, n_embd)
    assert jnp.allclose(out_bf16, ref, atol=3e-2, rtol=3e-2), "bf16 path mismatch"

    # --- Config 2: n_embd=128, hidden=512, th=128 (multi-k accumulator path) -
    B2, T2, n_embd2 = 2, 16, 128
    hidden2 = 4 * n_embd2
    k3, k4, k5 = jax.random.split(jax.random.PRNGKey(1), 3)
    x2 = jax.random.normal(k3, (B2, T2, n_embd2), dtype=jnp.float32)
    w_fc2, b_fc2 = _rand_linear(k4, hidden2, n_embd2)
    w_proj2, b_proj2 = _rand_linear(k5, n_embd2, hidden2)
    ref2 = _reference(x2, w_fc2, b_fc2, w_proj2, b_proj2)

    out2 = mlp_forward(x2, w_fc2, b_fc2, w_proj2, b_proj2,
                       compute_dtype=jnp.float32, th=128)   # forces 4 k-steps
    out2 = jax.block_until_ready(out2)
    assert out2.shape == (B2, T2, n_embd2)
    assert jnp.allclose(out2, ref2, atol=1e-4, rtol=1e-4), "multi-k path mismatch"

    print("KERNEL_OK")
</pallas_src>

<mosaic_0001>
module attributes {stable_mosaic.version = 11 : i64} {
  func.func @_mlp_kernel_single_k(%arg0: i32, %arg1: memref<16x128xf32, #tpu.memory_space<vmem>>, %arg2: memref<128x128xf32, #tpu.memory_space<vmem>>, %arg3: memref<1x128xf32, #tpu.memory_space<vmem>>, %arg4: memref<128x128xf32, #tpu.memory_space<vmem>>, %arg5: memref<1x128xf32, #tpu.memory_space<vmem>>, %arg6: memref<16x128xf32, #tpu.memory_space<vmem>>) attributes {dimension_semantics = [#tpu.dimension_semantics<parallel>], iteration_bounds = array<i64: 1>, scalar_prefetch = 0 : i64, scratch_operands = 0 : i64, tpu.core_type = #tpu.core_type<tc>, window_params = [{transform_indices = @transform_0, window_bounds = array<i64: 16, 128>}, {pipeline_mode = #tpu.pipeline_mode<synchronous>, transform_indices = @transform_1, window_bounds = array<i64: 128, 128>}, {pipeline_mode = #tpu.pipeline_mode<synchronous>, transform_indices = @transform_2, window_bounds = array<i64: 1, 128>}, {pipeline_mode = #tpu.pipeline_mode<synchronous>, transform_indices = @transform_3, window_bounds = array<i64: 128, 128>}, {pipeline_mode = #tpu.pipeline_mode<synchronous>, transform_indices = @transform_4, window_bounds = array<i64: 1, 128>}, {transform_indices = @transform_5, window_bounds = array<i64: 16, 128>}]} {
    %c0 = arith.constant 0 : index
    %c0_0 = arith.constant 0 : index
    %0 = vector.load %arg1[%c0, %c0_0] : memref<16x128xf32, #tpu.memory_space<vmem>>, vector<16x128xf32>
    %c0_1 = arith.constant 0 : index
    %c0_2 = arith.constant 0 : index
    %1 = vector.load %arg2[%c0_1, %c0_2] : memref<128x128xf32, #tpu.memory_space<vmem>>, vector<128x128xf32>
    %cst = arith.constant dense<0.000000e+00> : vector<16x128xf32>
    %2 = tpu.matmul %0, %1, %cst {dimension_numbers = #tpu.dot_dimension_numbers<[1], [0], [0], [1], [0, 0, 1, 1], [], []>} : vector<16x128xf32>, vector<128x128xf32>, vector<16x128xf32> -> vector<16x128xf32>
    %c0_3 = arith.constant 0 : index
    %c0_4 = arith.constant 0 : index
    %3 = vector.load %arg3[%c0_3, %c0_4] : memref<1x128xf32, #tpu.memory_space<vmem>>, vector<1x128xf32>
    %4 = vector.broadcast %3 : vector<1x128xf32> to vector<16x128xf32>
    %5 = arith.addf %2, %4 : vector<16x128xf32>
    %cst_5 = arith.constant 5.000000e-01 : f32
    %6 = vector.broadcast %cst_5 : f32 to vector<16x128xf32>
    %7 = arith.mulf %6, %5 : vector<16x128xf32>
    %8 = arith.mulf %5, %5 : vector<16x128xf32>
    %9 = arith.mulf %8, %5 : vector<16x128xf32>
    %cst_6 = arith.constant 4.471500e-02 : f32
    %10 = vector.broadcast %cst_6 : f32 to vector<16x128xf32>
    %11 = arith.mulf %10, %9 : vector<16x128xf32>
    %12 = arith.addf %5, %11 : vector<16x128xf32>
    %cst_7 = arith.constant 0.797884583 : f32
    %13 = vector.broadcast %cst_7 : f32 to vector<16x128xf32>
    %14 = arith.mulf %13, %12 : vector<16x128xf32>
    %15 = math.tanh %14 : vector<16x128xf32>
    %cst_8 = arith.constant 1.000000e+00 : f32
    %16 = vector.broadcast %cst_8 : f32 to vector<16x128xf32>
    %17 = arith.addf %16, %15 : vector<16x128xf32>
    %18 = arith.mulf %7, %17 : vector<16x128xf32>
    %c0_9 = arith.constant 0 : index
    %c0_10 = arith.constant 0 : index
    %19 = vector.load %arg4[%c0_9, %c0_10] : memref<128x128xf32, #tpu.memory_space<vmem>>, vector<128x128xf32>
    %cst_11 = arith.constant dense<0.000000e+00> : vector<16x128xf32>
    %20 = tpu.matmul %18, %19, %cst_11 {dimension_numbers = #tpu.dot_dimension_numbers<[1], [0], [0], [1], [0, 0, 1, 1], [], []>} : vector<16x128xf32>, vector<128x128xf32>, vector<16x128xf32> -> vector<16x128xf32>
    %c0_12 = arith.constant 0 : index
    %c0_13 = arith.constant 0 : index
    %21 = vector.load %arg5[%c0_12, %c0_13] : memref<1x128xf32, #tpu.memory_space<vmem>>, vector<1x128xf32>
    %22 = vector.broadcast %21 : vector<1x128xf32> to vector<16x128xf32>
    %23 = arith.addf %20, %22 : vector<16x128xf32>
    %c0_14 = arith.constant 0 : index
    %c0_15 = arith.constant 0 : index
    %24 = vector.load %arg6[%c0_14, %c0_15] : memref<16x128xf32, #tpu.memory_space<vmem>>, vector<16x128xf32>
    tpu.vector_store %arg6[%c0_14, %c0_15], %23 {strides = array<i32>} : memref<16x128xf32, #tpu.memory_space<vmem>>, vector<16x128xf32>,
    return
  }
  func.func @transform_0(%arg0: i32) -> (i32, i32) {
    %c0_i32 = arith.constant 0 : i32
    %c0_i32_0 = arith.constant 0 : i32
    return %arg0, %c0_i32 : i32, i32
  }
  func.func @transform_1(%arg0: i32) -> (i32, i32) {
    %c0_i32 = arith.constant 0 : i32
    %c0_i32_0 = arith.constant 0 : i32
    %c0_i32_1 = arith.constant 0 : i32
    return %c0_i32, %c0_i32_0 : i32, i32
  }
  func.func @transform_2(%arg0: i32) -> (i32, i32) {
    %c0_i32 = arith.constant 0 : i32
    %c0_i32_0 = arith.constant 0 : i32
    %c0_i32_1 = arith.constant 0 : i32
    return %c0_i32, %c0_i32_0 : i32, i32
  }
  func.func @transform_3(%arg0: i32) -> (i32, i32) {
    %c0_i32 = arith.constant 0 : i32
    %c0_i32_0 = arith.constant 0 : i32
    %c0_i32_1 = arith.constant 0 : i32
    return %c0_i32, %c0_i32_0 : i32, i32
  }
  func.func @transform_4(%arg0: i32) -> (i32, i32) {
    %c0_i32 = arith.constant 0 : i32
    %c0_i32_0 = arith.constant 0 : i32
    %c0_i32_1 = arith.constant 0 : i32
    return %c0_i32, %c0_i32_0 : i32, i32
  }
  func.func @transform_5(%arg0: i32) -> (i32, i32) {
    %c0_i32 = arith.constant 0 : i32
    %c0_i32_0 = arith.constant 0 : i32
    return %arg0, %c0_i32 : i32, i32
  }
}

</mosaic_0001>

<bundles_post_ra>
// kernel: tpu_custom_call.1
= control target key start
LH: loop header
LB: loop body
LE: loop exit
PB: predicated region body
PF: predicated region fallthrough
CT: control target
= control target key end

     0   :  { %10 = vsyncpa [#allocation3], 0  ;;  %s775_s0 = inlined_call_operand.hbm [shape: f32[16,128], index: 0, kind: input, shape index: {}]   ;;  %s776_s1 = inlined_call_operand.hbm [shape: f32[128,128], index: 1, kind: input, shape index: {}]   ;;  %s777_s2 = inlined_call_operand.hbm [shape: f32[1,128], index: 2, kind: input, shape index: {}]   ;;  %s778_s3 = inlined_call_operand.hbm [shape: f32[128,128], index: 3, kind: input, shape index: {}]   ;;  %s779_s4 = inlined_call_operand.hbm [shape: f32[1,128], index: 4, kind: input, shape index: {}]   ;;  %s780_s5 = inlined_call_operand.hbm [shape: f32[16,128], index: 5, kind: output, shape index: {}]  }
   0x1   :  { %11 = vsyncpa [#allocation6], 0 }
   0x2   :  { %12 = vsyncpa [#allocation9], 0 }
   0x3   :  { %13 = vsyncpa [#allocation4], 0  ;;  %s646_s18 = smov [#allocation5]   ;;  %s647_s20 = smov [#allocation8]  }
   0x4   :  { %s31_s19 = sshll.u32 %s646_s18, 4  ;;  %s53_s21 = sshll.u32 %s647_s20, 4  ;;  %s32_s19 = int_to_ptr.vmem [resolvable:$true] %s31_s19  ;;  %s684_s21 = int_to_ptr.vmem [resolvable:$true] %s53_s21 }
   0x5   :  { %s506_s24 = scalar_lea.hbm %s776_s1, 2048 }
   0x6   :  { %p507_p0 = scmp.ne.s32.totalorder %s776_s1, %s506_s24  ;;  %p510_p1 = scmp.lt.u32.totalorder %s506_s24, %s776_s1 }
   0x8   :  { %p512_p2 = pnand %p510_p1, %p507_p0 }
   0xa   :  { %515 = shalt.err (!%p512_p2)
}
   0xb   :  { %s516_s29 = scalar_lea.vmem %s32_s19, 2048  ;;  %p521_p4 = scmp.lt.s32.totalorder %s32_s19, %s32_s19 }
   0xc   :  { %p517_p3 = scmp.ne.s32.totalorder %s32_s19, %s516_s29  ;;  %p522_p5 = scmp.lt.s32.totalorder %s516_s29, %s516_s29 }
   0xe   :  { %p523_p6 = por %p522_p5, %p521_p4 }
  0x10   :  { %p524_p7 = pnand %p523_p6, %p517_p3 }
  0x12   :  { %527 = shalt.err (!%p524_p7)
}
  0x13   :  { %s648_s30 = smov 128   ;;  %s649_s6 = smov 8  }
  0x14   :  { %37 = dma.hbm_to_vmem [thread:$0]  %s776_s1, 2048, %s32_s19, [#allocation6], %s648_s30, %s648_s30, %s649_s6  }
  0x15   :  { %s528_s11 = scalar_lea.hbm %s778_s3, 2048 }
  0x16   :  { %p529_p8 = scmp.ne.s32.totalorder %s778_s3, %s528_s11  ;;  %p532_p9 = scmp.lt.u32.totalorder %s528_s11, %s778_s3 }
  0x18   :  { %p534_p10 = pnand %p532_p9, %p529_p8 }
  0x1a   :  { %537 = shalt.err (!%p534_p10)
}
  0x1b   :  { %s538_s16 = scalar_lea.vmem %s684_s21, 2048  ;;  %p543_p12 = scmp.lt.s32.totalorder %s684_s21, %s684_s21 }
  0x1c   :  { %p539_p11 = scmp.ne.s32.totalorder %s684_s21, %s538_s16  ;;  %p544_p13 = scmp.lt.s32.totalorder %s538_s16, %s538_s16 }
  0x1e   :  { %p545_p0 = por %p544_p13, %p543_p12 }
  0x20   :  { %p546_p1 = pnand %p545_p0, %p539_p11 }
  0x22   :  { %549 = shalt.err (!%p546_p1)
}
  0x23   :  { %59 = dma.hbm_to_vmem [thread:$0]  %s778_s3, 2048, %s684_s21, [#allocation9], %s648_s30, %s648_s30, %s649_s6  }
  0x24   :  { %s650_s18 = smov [#allocation2]   ;;  %s651_s20 = smov [#allocation7]  }
  0x25   :  { %s19_s19 = sshll.u32 %s650_s18, 4  ;;  %s44_s22 = sshll.u32 %s651_s20, 4  ;;  %s20_s19 = int_to_ptr.vmem [resolvable:$true] %s19_s19  ;;  %s45_s22 = int_to_ptr.vmem [resolvable:$true] %s44_s22 }
  0x26   :  { %s550_s25 = scalar_lea.hbm %s775_s0, 256 }
  0x27   :  { %p551_p2 = scmp.ne.s32.totalorder %s775_s0, %s550_s25  ;;  %p554_p3 = scmp.lt.u32.totalorder %s550_s25, %s775_s0 }
  0x29   :  { %p556_p4 = pnand %p554_p3, %p551_p2 }
  0x2b   :  { %559 = shalt.err (!%p556_p4)
}
  0x2c   :  { %s560_s3 = scalar_lea.vmem %s20_s19, 256  ;;  %p565_p6 = scmp.lt.s32.totalorder %s20_s19, %s20_s19 }
  0x2d   :  { %p561_p5 = scmp.ne.s32.totalorder %s20_s19, %s560_s3  ;;  %p566_p7 = scmp.lt.s32.totalorder %s560_s3, %s560_s3 }
  0x2f   :  { %p567_p8 = por %p566_p7, %p565_p6 }
  0x31   :  { %p568_p9 = pnand %p567_p8, %p561_p5 }
  0x33   :  { %571 = shalt.err (!%p568_p9)
}
  0x34   :  { %25 = dma.hbm_to_vmem [thread:$0]  %s775_s0, 256, %s20_s19, [#allocation3], %s648_s30, %s648_s30, %s649_s6  }
  0x35   :  { %s572_s10 = scalar_lea.hbm %s777_s2, 16 }
  0x36   :  { %p573_p10 = scmp.ne.s32.totalorder %s777_s2, %s572_s10  ;;  %p576_p11 = scmp.lt.u32.totalorder %s572_s10, %s777_s2 }
  0x38   :  { %p578_p12 = pnand %p576_p11, %p573_p10 }
  0x3a   :  { %581 = shalt.err (!%p578_p12)
}
  0x3b   :  { %s582_s15 = scalar_lea.vmem %s45_s22, 16  ;;  %s586_s16 = scalar_lea.vmem %s45_s22, 32 }
  0x3c   :  { %p583_p13 = scmp.ne.s32.totalorder %s45_s22, %s582_s15  ;;  %p587_p0 = scmp.lt.s32.totalorder %s45_s22, %s45_s22 }
  0x3d   :  { %p588_p1 = scmp.lt.s32.totalorder %s586_s16, %s582_s15 }
  0x3f   :  { %p589_p2 = por %p588_p1, %p587_p0 }
  0x41   :  { %p590_p3 = pnand %p589_p2, %p583_p13 }
  0x43   :  { %593 = shalt.err (!%p590_p3)
}
  0x44   :  { %47 = dma.hbm_to_vmem [thread:$0]  %s777_s2, 16, %s45_s22, [#allocation6]  }
  0x45   :  { %s652_s17 = smov [#allocation10]   ;;  %s594_s23 = scalar_lea.hbm %s779_s4, 16 }
  0x46   :  { %s66_s18 = sshll.u32 %s652_s17, 4  ;;  %p595_p4 = scmp.ne.s32.totalorder %s779_s4, %s594_s23  ;;  %s67_s18 = int_to_ptr.vmem [resolvable:$true] %s66_s18 }
  0x47   :  { %p598_p5 = scmp.lt.u32.totalorder %s594_s23, %s779_s4 }
  0x49   :  { %p600_p6 = pnand %p598_p5, %p595_p4 }
  0x4b   :  { %603 = shalt.err (!%p600_p6)
}
  0x4c   :  { %s604_s28 = scalar_lea.vmem %s67_s18, 16  ;;  %s608_s2 = scalar_lea.vmem %s67_s18, 32 }
  0x4d   :  { %p605_p7 = scmp.ne.s32.totalorder %s67_s18, %s604_s28  ;;  %p609_p8 = scmp.lt.s32.totalorder %s67_s18, %s67_s18 }
  0x4e   :  { %p610_p9 = scmp.lt.s32.totalorder %s608_s2, %s604_s28 }
  0x50   :  { %p611_p10 = por %p610_p9, %p609_p8 }
  0x52   :  { %p612_p11 = pnand %p611_p10, %p605_p7 }
  0x54   :  { %615 = shalt.err (!%p612_p11)
}
  0x55   :  { %69 = dma.hbm_to_vmem [thread:$0]  %s779_s4, 16, %s67_s18, [#allocation9]  }
  0x56   :  { %638 = dma.done.wait [#allocation3], 256  }
  0x57   :  { %639 = vsyncadd [#allocation3], 4294967040 }
  0x58   :  { %640 = dma.done.wait [#allocation6], 2064  }
  0x59   :  { %641 = vsyncadd [#allocation6], 4294965232 }
  0x5a   :  { %642 = dma.done.wait [#allocation9], 2064  }
  0x5b   :  { %643 = vsyncadd [#allocation9], 4294965232  ;;  %v87_v0 = vld [vmem:[#allocation5] sm:$0xff]  ;;  %v88_v1 = vld [vmem:[#allocation5 + $0x8] sm:$0xff]  ;;  %s653_s4 = smov [#allocation11]  }
  0x5c   :  { %v89_v2 = vld [vmem:[#allocation5 + $0x10] sm:$0xff]  ;;  %v430_v3 = vpack.c.bf16 %v88_v1, %v87_v0  ;;  %v90_v4 = vld [vmem:[#allocation5 + $0x18] sm:$0xff]  ;;  %v91_v6 = vld [vmem:[#allocation5 + $0x20] sm:$0xff]  ;;  %s308_s3 = sshll.u32 %s653_s4, 4  ;;  %s309_s3 = int_to_ptr.vmem [resolvable:$true] %s308_s3 }
  0x5d   :  { %v434_v5 = vpack.c.bf16 %v90_v4, %v89_v2  ;;  %v92_v7 = vld [vmem:[#allocation5 + $0x28] sm:$0xff]  ;;  %v93_v9 = vld [vmem:[#allocation5 + $0x30] sm:$0xff]  ;;  %v94_v11 = vld [vmem:[#allocation5 + $0x38] sm:$0xff]  ;;  %s616_s21 = scalar_lea.vmem %s309_s3, 256  ;;  %p621_p13 = scmp.lt.s32.totalorder %s309_s3, %s309_s3 }
  0x5e   :  { %431 = vmatprep.subr.bf16.mxu0 %v430_v3  ;;  %v438_v8 = vpack.c.bf16 %v92_v7, %v91_v6  ;;  %v85_v10 = vld [vmem:[#allocation2] sm:$0xff]  ;;  %v203_v12 = vld [vmem:[#allocation8] sm:$0xff]  ;;  %v442_v15 = vpack.c.bf16 %v94_v11, %v93_v9  ;;  %v98_v20 = vld [vmem:[#allocation5 + $0x58] sm:$0xff]  ;;  %p617_p12 = scmp.ne.s32.totalorder %s309_s3, %s616_s21  ;;  %p622_p0 = scmp.lt.s32.totalorder %s616_s21, %s616_s21 }
  0x5f   :  { %433 = vmatpush3.bf16.msra.mxu0 %v430_v3  ;;  %392 = vmatprep.mubr.f32.mxu0 %v85_v10  ;;  %v204_v13 = vld [vmem:[#allocation8 + $0x8] sm:$0xff]  ;;  %v95_v16 = vld [vmem:[#allocation5 + $0x40] sm:$0xff]  ;;  %v102_v26 = vld [vmem:[#allocation5 + $0x78] sm:$0xff] }
  0x60   :  { %435 = vmatprep.subr.bf16.mxu0 %v434_v5  ;;  %v462_v14 = vpack.c.bf16 %v204_v13, %v203_v12  ;;  %v96_v17 = vld [vmem:[#allocation5 + $0x48] sm:$0xff]  ;;  %v97_v19 = vld [vmem:[#allocation5 + $0x50] sm:$0xff]  ;;  %v99_v22 = vld [vmem:[#allocation5 + $0x60] sm:$0xff]  ;;  %p623_p1 = por %p622_p0, %p621_p13 }
  0x61   :  { %v446_v18 = vpack.c.bf16 %v96_v17, %v95_v16  ;;  %v450_v21 = vpack.c.bf16 %v98_v20, %v97_v19  ;;  %v100_v23 = vld [vmem:[#allocation5 + $0x68] sm:$0xff]  ;;  %v101_v25 = vld [vmem:[#allocation5 + $0x70] sm:$0xff]  ;;  %v86_v28 = vld [vmem:[#allocation2 + $0x8] sm:$0xff] }
  0x62   :  { %463 = vmatprep.subr.bf16.mxu1 %v462_v14  ;;  %v454_v24 = vpack.c.bf16 %v100_v23, %v99_v22  ;;  %v458_v27 = vpack.c.bf16 %v102_v26, %v101_v25  ;;  %v205_v29 = vld [vmem:[#allocation8 + $0x10] sm:$0xff]  ;;  %v206_v30 = vld [vmem:[#allocation8 + $0x18] sm:$0xff]  ;;  %v207_v32 = vld [vmem:[#allocation8 + $0x20] sm:$0xff]  ;;  %p624_p2 = pnand %p623_p1, %p617_p12 }
  0x63   :  { %437 = vmatpush3.bf16.msra.mxu0 %v434_v5  ;;  %465 = vmatpush3.bf16.msra.mxu1 %v462_v14  ;;  %v466_v31 = vpack.c.bf16 %v206_v30, %v205_v29  ;;  %v208_v33 = vld [vmem:[#allocation8 + $0x28] sm:$0xff]  ;;  %v209_v35 = vld [vmem:[#allocation8 + $0x30] sm:$0xff]  ;;  %v210_v36 = vld [vmem:[#allocation8 + $0x38] sm:$0xff] }
  0x64   :  { %439 = vmatprep.subr.bf16.mxu0 %v438_v8  ;;  %v470_v34 = vpack.c.bf16 %v208_v33, %v207_v32  ;;  %v474_v37 = vpack.c.bf16 %v210_v36, %v209_v35  ;;  %v211_v38 = vld [vmem:[#allocation8 + $0x40] sm:$0xff]  ;;  %v212_v39 = vld [vmem:[#allocation8 + $0x48] sm:$0xff]  ;;  %v213_v40 = vld [vmem:[#allocation8 + $0x50] sm:$0xff] }
  0x65   :  { %467 = vmatprep.subr.bf16.mxu1 %v466_v31  ;;  %v478_v41 = vpack.c.bf16 %v212_v39, %v211_v38  ;;  %v214_v42 = vld [vmem:[#allocation8 + $0x58] sm:$0xff]  ;;  %v215_v44 = vld [vmem:[#allocation8 + $0x60] sm:$0xff]  ;;  %v216_v45 = vld [vmem:[#allocation8 + $0x68] sm:$0xff] }
  0x66   :  { %v482_v43 = vpack.c.bf16 %v214_v42, %v213_v40  ;;  %v486_v46 = vpack.c.bf16 %v216_v45, %v215_v44  ;;  %v217_v47 = vld [vmem:[#allocation8 + $0x70] sm:$0xff]  ;;  %v218_v48 = vld [vmem:[#allocation8 + $0x78] sm:$0xff]  ;;  %v323_v9 = vld [vmem:[#allocation10] ss:$0 sm:$0xff] }
  0x67   :  { %441 = vmatpush3.bf16.msra.mxu0 %v438_v8  ;;  %469 = vmatpush3.bf16.msra.mxu1 %v466_v31  ;;  %v490_v49 = vpack.c.bf16 %v218_v48, %v217_v47  ;;  %v322_v50 = vld [vmem:[#allocation7] ss:$0 sm:$0xff] }
  0x68   :  { %443 = vmatprep.subr.bf16.mxu0 %v442_v15  ;;  %471 = vmatprep.subr.bf16.mxu1 %v470_v34 }
  0x6b   :  { %445 = vmatpush3.bf16.msra.mxu0 %v442_v15  ;;  %473 = vmatpush3.bf16.msra.mxu1 %v470_v34 }
  0x6c   :  { %447 = vmatprep.subr.bf16.mxu0 %v446_v18  ;;  %475 = vmatprep.subr.bf16.mxu1 %v474_v37 }
  0x6f   :  { %449 = vmatpush3.bf16.msra.mxu0 %v446_v18  ;;  %477 = vmatpush3.bf16.msra.mxu1 %v474_v37 }
  0x70   :  { %451 = vmatprep.subr.bf16.mxu0 %v450_v21  ;;  %479 = vmatprep.subr.bf16.mxu1 %v478_v41 }
  0x73   :  { %453 = vmatpush3.bf16.msra.mxu0 %v450_v21  ;;  %481 = vmatpush3.bf16.msra.mxu1 %v478_v41 }
  0x74   :  { %455 = vmatprep.subr.bf16.mxu0 %v454_v24  ;;  %483 = vmatprep.subr.bf16.mxu1 %v482_v43 }
  0x77   :  { %457 = vmatpush3.bf16.msra.mxu0 %v454_v24  ;;  %485 = vmatpush3.bf16.msra.mxu1 %v482_v43 }
  0x78   :  { %459 = vmatprep.subr.bf16.mxu0 %v458_v27  ;;  %487 = vmatprep.subr.bf16.mxu1 %v486_v46 }
  0x7b   :  { %461 = vmatpush3.bf16.msra.mxu0 %v458_v27  ;;  %489 = vmatpush3.bf16.msra.mxu1 %v486_v46 }
  0x7c   :  { %491 = vmatprep.subr.bf16.mxu1 %v490_v49 }
  0x7e   :  { %393 = vmatmul.mubr.f32.vlgmr.msra.gmra.mrb[0].mxu0 %v86_v28 }
  0x7f   :  { %493 = vmatpush3.bf16.msra.mxu1 %v490_v49 }
 0x151   :  { %v394_v51 = vpop.f32.mrb[0].mxu0 }
 0x152   :  { %v182_v52 = vadd.f32 %v394_v51, %v322_v50  ;;  %v176_v53 = vpop.f32.mrb[1].mxu0 }
 0x153   :  { %v177_v54 = vadd.f32 %v322_v50, %v176_v53 }
 0x154   :  { %v188_v55 = vmul.f32 %v182_v52, %v182_v52  ;;  %v186_v6 = vmul.f32 0.5, %v182_v52 }
 0x155   :  { %v187_v56 = vmul.f32 %v177_v54, %v177_v54  ;;  %v185_v4 = vmul.f32 0.5, %v177_v54 }
 0x156   :  { %v190_v57 = vmul.f32 %v188_v55, %v182_v52 }
 0x157   :  { %v189_v58 = vmul.f32 %v187_v56, %v177_v54 }
 0x158   :  { %v192_v59 = vmul.f32 0.044715, %v190_v57 }
 0x159   :  { %v191_v60 = vmul.f32 0.044715, %v189_v58 }
 0x15a   :  { %v194_v61 = vadd.f32 %v192_v59, %v182_v52 }
 0x15b   :  { %v193_v62 = vadd.f32 %v191_v60, %v177_v54 }
 0x15c   :  { %v196_v63 = vmul.f32 0.7978846, %v194_v61 }
 0x15d   :  { %v195_v0 = vmul.f32 0.7978846, %v193_v62 }
 0x15e   :  { %502 = vtanh.f32 %v196_v63 }
 0x15f   :  { %504 = vtanh.f32 %v195_v0 }
 0x168   :  { %v503_v1 = vpop.eup %502 }
 0x169   :  { %v505_v2 = vpop.eup %504  ;;  %v200_v3 = vadd.f32 1.0, %v503_v1 }
 0x16a   :  { %v199_v5 = vadd.f32 1.0, %v505_v2 }
 0x16b   :  { %v202_v8 = vmul.f32 %v200_v3, %v186_v6 }
 0x16c   :  { %v201_v7 = vmul.f32 %v199_v5, %v185_v4 }
 0x16e   :  { %427 = vmatprep.mubr.f32.mxu1 %v201_v7 }
 0x16f   :  { %428 = vmatmul.mubr.f32.vlgmr.msra.gmra.mrb[0].mxu1 %v202_v8 }
 0x242   :  { %v429_v10 = vpop.f32.mrb[0].mxu1 }
 0x243   :  { %v298_v11 = vadd.f32 %v429_v10, %v323_v9  ;;  %v292_v12 = vpop.f32.mrb[1].mxu1 }
 0x244   :  { %v293_v13 = vadd.f32 %v323_v9, %v292_v12 }
 0x245   :  { %302 = vst [vmem:[#allocation11 + $0x8] sm:$0xff] %v298_v11 }
 0x246   :  { %301 = vst [vmem:[#allocation11] sm:$0xff] %v293_v13 }
 0x247   :  { %627 = shalt.err (!%p624_p2)
}
 0x248   :  { %s628_s9 = scalar_lea.hbm %s780_s5, 256 }
 0x249   :  { %p629_p3 = scmp.ne.s32.totalorder %s780_s5, %s628_s9  ;;  %p632_p4 = scmp.lt.u32.totalorder %s628_s9, %s780_s5 }
 0x24b   :  { %p634_p5 = pnand %p632_p4, %p629_p3 }
 0x24d   :  { %637 = shalt.err (!%p634_p5)
}
 0x24e   :  { %314 = dma.vmem_to_hbm [thread:$0]  %s309_s3, 256, %s780_s5, [#allocation4], %s648_s30, %s648_s30, %s649_s6  }
 0x24f   :  { %644 = dma.done.wait [#allocation4], 256  }
 0x250   :  { %645 = vsyncadd [#allocation4], 4294967040 }
 0x251   :  { %318 = vsyncpa [#allocation3], 1 }
 0x252   :  { %319 = vsyncpa [#allocation6], 1 }
 0x253   :  { %320 = vsyncpa [#allocation9], 1 }
 0x254   :  { %321 = vsyncpa [#allocation4], 1 }

</bundles_post_ra>
